<compile_context>
chip_gen: v7x
topology: tpu7x:2x2x1
jax: 0.10.0
libtpu: 0.0.40
codegen_flags: <defaults>
</compile_context>

<pallas_src>
import functools
import math

import jax
import jax.numpy as jnp
from jax.experimental import pallas as pl
from jax.experimental.pallas import tpu as pltpu


def _flash_attention_kernel(xq_ref, xkv_ref, wq_ref, wkv_ref, bq_ref, bkv_ref,
                            o_ref, q_sc, m_sc, l_sc, acc_sc, *, scale, hp):
    ki = pl.program_id(2)

    @pl.when(ki == 0)
    def _init():
        # Project this q tile once; fold the 1/sqrt(H) scale into q.
        xq = xq_ref[0].astype(jnp.bfloat16)                       # (Tq, D)
        q = jnp.dot(xq, wq_ref[...], preferred_element_type=jnp.float32)
        q = (q + bq_ref[...]) * scale                             # (Tq, Hp) f32
        q_sc[...] = q.astype(jnp.bfloat16)
        m_sc[...] = jnp.full_like(m_sc, -jnp.inf)
        l_sc[...] = jnp.zeros_like(l_sc)
        acc_sc[...] = jnp.zeros_like(acc_sc)

    # Fused K/V projection for this kv tile: one (Tk, D) @ (D, 2*Hp) matmul.
    xkv = xkv_ref[0].astype(jnp.bfloat16)                         # (Tk, D)
    kv = jnp.dot(xkv, wkv_ref[...], preferred_element_type=jnp.float32)
    kv = kv + bkv_ref[...]                                        # (Tk, 2*Hp) f32
    k = kv[:, :hp].astype(jnp.bfloat16)                           # (Tk, Hp)
    v = kv[:, hp:].astype(jnp.bfloat16)                           # (Tk, Hp)

    # scores: contract the hidden axis of q and k directly (no k.T).
    s = jax.lax.dot_general(
        q_sc[...], k,
        dimension_numbers=(((1,), (1,)), ((), ())),
        preferred_element_type=jnp.float32)                       # (Tq, Tk)

    # Online-softmax update (f32).
    m_new = jnp.maximum(m_sc[...], jnp.max(s, axis=-1, keepdims=True))
    alpha = jnp.exp(m_sc[...] - m_new)
    p = jnp.exp(s - m_new)
    l_sc[...] = alpha * l_sc[...] + jnp.sum(p, axis=-1, keepdims=True)
    acc_sc[...] = alpha * acc_sc[...] + jnp.dot(
        p.astype(jnp.bfloat16), v, preferred_element_type=jnp.float32)
    m_sc[...] = m_new

    @pl.when(ki == pl.num_programs(2) - 1)
    def _finalize():
        inv_l = pl.reciprocal(l_sc[...], approx=True)
        o_ref[0] = (acc_sc[...] * inv_l).astype(o_ref.dtype)


def _pick_tile(s, target):
    """Largest multiple-of-8 tile <= target that divides s; falls back to s."""
    t = min(target, s)
    t -= t % 8
    while t >= 8:
        if s % t == 0:
            return t
        t -= 8
    return s


def attention(x, wq, wk, wv, bq, bk, bv, *, q_tile=256, kv_tile=512):
    """x: (B, S, D) f32; wq/wk/wv: (D, H); bq/bk/bv: (1, H). Returns (B, S, H)."""
    B, S, D = x.shape
    H = wq.shape[1]
    Hp = ((H + 127) // 128) * 128          # lane-dense padded hidden dim
    scale = 1.0 / math.sqrt(H)             # scale uses the *real* hidden_dim

    pad = [(0, 0), (0, Hp - H)]
    wq_p = jnp.pad(wq, pad).astype(jnp.bfloat16)                            # (D, Hp)
    wkv_p = jnp.concatenate(
        [jnp.pad(wk, pad), jnp.pad(wv, pad)], axis=1).astype(jnp.bfloat16)  # (D, 2Hp)
    bq_p = jnp.pad(bq, pad)                                                 # (1, Hp)
    bkv_p = jnp.concatenate([jnp.pad(bk, pad), jnp.pad(bv, pad)], axis=1)   # (1, 2Hp)

    tq = _pick_tile(S, q_tile)
    tk = _pick_tile(S, kv_tile)
    nq, nk = S // tq, S // tk

    kernel = functools.partial(_flash_attention_kernel, scale=scale, hp=Hp)

    out = pl.pallas_call(
        kernel,
        out_shape=jax.ShapeDtypeStruct((B, S, Hp), x.dtype),
        grid_spec=pltpu.PrefetchScalarGridSpec(
            num_scalar_prefetch=0,
            grid=(B, nq, nk),
            in_specs=[
                pl.BlockSpec((1, tq, D), lambda b, qi, ki: (b, qi, 0)),   # x (q rows)
                pl.BlockSpec((1, tk, D), lambda b, qi, ki: (b, ki, 0)),   # x (kv rows)
                pl.BlockSpec((D, Hp), lambda b, qi, ki: (0, 0)),          # W_Q
                pl.BlockSpec((D, 2 * Hp), lambda b, qi, ki: (0, 0)),      # W_K|W_V fused
                pl.BlockSpec((1, Hp), lambda b, qi, ki: (0, 0)),          # b_Q
                pl.BlockSpec((1, 2 * Hp), lambda b, qi, ki: (0, 0)),      # b_K|b_V fused
            ],
            out_specs=pl.BlockSpec((1, tq, Hp), lambda b, qi, ki: (b, qi, 0)),
            scratch_shapes=[
                pltpu.VMEM((tq, Hp), jnp.bfloat16),   # cached (scaled) q tile
                pltpu.VMEM((tq, 1), jnp.float32),     # running max
                pltpu.VMEM((tq, 1), jnp.float32),     # running denominator
                pltpu.VMEM((tq, Hp), jnp.float32),    # output accumulator
            ],
        ),
        compiler_params=pltpu.CompilerParams(
            dimension_semantics=("parallel", "parallel", "arbitrary")),
    )(x, x, wq_p, wkv_p, bq_p, bkv_p)

    return out[..., :H]


def reference(x, wq, wk, wv, bq, bk, bv):
    q = x @ wq + bq
    k = x @ wk + bk
    v = x @ wv + bv
    scores = q @ jnp.swapaxes(k, -2, -1) / math.sqrt(q.shape[-1])
    prob = jax.nn.softmax(scores, axis=-1)
    return prob @ v


def _make_inputs(key, B, S, model_dim, hidden_dim):
    kx, kwq, kwk, kwv, kbq, kbk, kbv = jax.random.split(key, 7)
    bound = 1.0 / math.sqrt(model_dim)
    x = jax.random.normal(kx, (B, S, model_dim), dtype=jnp.float32)
    # Stored as (model_dim, hidden_dim) == W.T of PyTorch's (out, in) weight.
    wq = jax.random.uniform(kwq, (model_dim, hidden_dim), jnp.float32, -bound, bound)
    wk = jax.random.uniform(kwk, (model_dim, hidden_dim), jnp.float32, -bound, bound)
    wv = jax.random.uniform(kwv, (model_dim, hidden_dim), jnp.float32, -bound, bound)
    bq = jax.random.uniform(kbq, (1, hidden_dim), jnp.float32, -bound, bound)
    bk = jax.random.uniform(kbk, (1, hidden_dim), jnp.float32, -bound, bound)
    bv = jax.random.uniform(kbv, (1, hidden_dim), jnp.float32, -bound, bound)
    return x, wq, wk, wv, bq, bk, bv


if __name__ == "__main__":
    B, S, model_dim, hidden_dim = 2, 8, 32, 32
    key = jax.random.PRNGKey(0)

    args = _make_inputs(key, B, S, model_dim, hidden_dim)
    out = attention(*args)
    jax.block_until_ready(out)
    ref = reference(*args)
    assert out.shape == (B, S, hidden_dim)
    # bf16 MXU operands + approx reciprocal => looser tolerance than pure-f32.
    assert jnp.allclose(out, ref, atol=2e-2, rtol=2e-2), "mismatch vs reference"

    # Exercise the multi-tile online-softmax path (nq=4, nk=2) as well.
    args2 = _make_inputs(jax.random.PRNGKey(0), 2, 1024, model_dim, hidden_dim)
    out2 = attention(*args2)
    jax.block_until_ready(out2)
    ref2 = reference(*args2)
    assert out2.shape == (2, 1024, hidden_dim)
    assert jnp.allclose(out2, ref2, atol=2e-2, rtol=2e-2), "mismatch vs reference (tiled)"

    print("KERNEL_OK")
</pallas_src>

<mosaic_0001>
module attributes {stable_mosaic.version = 11 : i64} {
  func.func @_flash_attention_kernel(%arg0: i32, %arg1: i32, %arg2: i32, %arg3: memref<1x8x32xf32, #tpu.memory_space<vmem>>, %arg4: memref<1x8x32xf32, #tpu.memory_space<vmem>>, %arg5: memref<32x128xbf16, #tpu.memory_space<vmem>>, %arg6: memref<32x256xbf16, #tpu.memory_space<vmem>>, %arg7: memref<1x128xf32, #tpu.memory_space<vmem>>, %arg8: memref<1x256xf32, #tpu.memory_space<vmem>>, %arg9: memref<1x8x128xf32, #tpu.memory_space<vmem>>, %arg10: memref<8x128xbf16, #tpu.memory_space<vmem>>, %arg11: memref<8x1xf32, #tpu.memory_space<vmem>>, %arg12: memref<8x1xf32, #tpu.memory_space<vmem>>, %arg13: memref<8x128xf32, #tpu.memory_space<vmem>>) attributes {dimension_semantics = [#tpu.dimension_semantics<parallel>, #tpu.dimension_semantics<parallel>, #tpu.dimension_semantics<arbitrary>], iteration_bounds = array<i64: 2, 1, 1>, scalar_prefetch = 0 : i64, scratch_operands = 4 : i64, tpu.core_type = #tpu.core_type<tc>, window_params = [{transform_indices = @transform_0, window_bounds = array<i64: 1, 8, 32>}, {transform_indices = @transform_1, window_bounds = array<i64: 1, 8, 32>}, {pipeline_mode = #tpu.pipeline_mode<synchronous>, transform_indices = @transform_2, window_bounds = array<i64: 32, 128>}, {pipeline_mode = #tpu.pipeline_mode<synchronous>, transform_indices = @transform_3, window_bounds = array<i64: 32, 256>}, {pipeline_mode = #tpu.pipeline_mode<synchronous>, transform_indices = @transform_4, window_bounds = array<i64: 1, 128>}, {pipeline_mode = #tpu.pipeline_mode<synchronous>, transform_indices = @transform_5, window_bounds = array<i64: 1, 256>}, {transform_indices = @transform_6, window_bounds = array<i64: 1, 8, 128>}]} {
    %c0_i32 = arith.constant 0 : i32
    %0 = arith.cmpi eq, %arg2, %c0_i32 : i32
    %1 = arith.extui %0 : i1 to i32
    %c0_i32_0 = arith.constant 0 : i32
    %2 = arith.cmpi ne, %1, %c0_i32_0 : i32
    scf.if %2 {
      %c0_29 = arith.constant 0 : index
      %c0_30 = arith.constant 0 : index
      %c0_31 = arith.constant 0 : index
      %44 = vector.load %arg3[%c0_29, %c0_30, %c0_31] : memref<1x8x32xf32, #tpu.memory_space<vmem>>, vector<1x8x32xf32>
      %45 = vector.shape_cast %44 : vector<1x8x32xf32> to vector<8x32xf32>
      %46 = arith.truncf %45 : vector<8x32xf32> to vector<8x32xbf16>
      %c0_32 = arith.constant 0 : index
      %c0_33 = arith.constant 0 : index
      %47 = vector.load %arg5[%c0_32, %c0_33] : memref<32x128xbf16, #tpu.memory_space<vmem>>, vector<32x128xbf16>
      %cst_34 = arith.constant dense<0.000000e+00> : vector<8x128xf32>
      %48 = tpu.matmul %46, %47, %cst_34 {dimension_numbers = #tpu.dot_dimension_numbers<[1], [0], [0], [1], [0, 0, 1, 1], [], []>} : vector<8x32xbf16>, vector<32x128xbf16>, vector<8x128xf32> -> vector<8x128xf32>
      %c0_35 = arith.constant 0 : index
      %c0_36 = arith.constant 0 : index
      %49 = vector.load %arg7[%c0_35, %c0_36] : memref<1x128xf32, #tpu.memory_space<vmem>>, vector<1x128xf32>
      %50 = vector.broadcast %49 : vector<1x128xf32> to vector<8x128xf32>
      %51 = arith.addf %48, %50 : vector<8x128xf32>
      %cst_37 = arith.constant 0.176776692 : f32
      %52 = vector.broadcast %cst_37 : f32 to vector<8x128xf32>
      %53 = arith.mulf %51, %52 : vector<8x128xf32>
      %54 = arith.truncf %53 : vector<8x128xf32> to vector<8x128xbf16>
      %c0_38 = arith.constant 0 : index
      %c0_39 = arith.constant 0 : index
      %55 = vector.load %arg10[%c0_38, %c0_39] : memref<8x128xbf16, #tpu.memory_space<vmem>>, vector<8x128xbf16>
      tpu.vector_store %arg10[%c0_38, %c0_39], %54 {strides = array<i32>} : memref<8x128xbf16, #tpu.memory_space<vmem>>, vector<8x128xbf16>,
      %cst_40 = arith.constant 0xFF800000 : f32
      %56 = vector.broadcast %cst_40 : f32 to vector<8x1xf32>
      %c0_41 = arith.constant 0 : index
      %c0_42 = arith.constant 0 : index
      %57 = vector.load %arg11[%c0_41, %c0_42] : memref<8x1xf32, #tpu.memory_space<vmem>>, vector<8x1xf32>
      tpu.vector_store %arg11[%c0_41, %c0_42], %56 {strides = array<i32>} : memref<8x1xf32, #tpu.memory_space<vmem>>, vector<8x1xf32>,
      %cst_43 = arith.constant 0.000000e+00 : f32
      %58 = vector.broadcast %cst_43 : f32 to vector<8x1xf32>
      %c0_44 = arith.constant 0 : index
      %c0_45 = arith.constant 0 : index
      %59 = vector.load %arg12[%c0_44, %c0_45] : memref<8x1xf32, #tpu.memory_space<vmem>>, vector<8x1xf32>
      tpu.vector_store %arg12[%c0_44, %c0_45], %58 {strides = array<i32>} : memref<8x1xf32, #tpu.memory_space<vmem>>, vector<8x1xf32>,
      %cst_46 = arith.constant 0.000000e+00 : f32
      %60 = vector.broadcast %cst_46 : f32 to vector<8x128xf32>
      %c0_47 = arith.constant 0 : index
      %c0_48 = arith.constant 0 : index
      %61 = vector.load %arg13[%c0_47, %c0_48] : memref<8x128xf32, #tpu.memory_space<vmem>>, vector<8x128xf32>
      tpu.vector_store %arg13[%c0_47, %c0_48], %60 {strides = array<i32>} : memref<8x128xf32, #tpu.memory_space<vmem>>, vector<8x128xf32>,
    } else {
    }
    %c0 = arith.constant 0 : index
    %c0_1 = arith.constant 0 : index
    %c0_2 = arith.constant 0 : index
    %3 = vector.load %arg4[%c0, %c0_1, %c0_2] : memref<1x8x32xf32, #tpu.memory_space<vmem>>, vector<1x8x32xf32>
    %4 = vector.shape_cast %3 : vector<1x8x32xf32> to vector<8x32xf32>
    %5 = arith.truncf %4 : vector<8x32xf32> to vector<8x32xbf16>
    %c0_3 = arith.constant 0 : index
    %c0_4 = arith.constant 0 : index
    %6 = vector.load %arg6[%c0_3, %c0_4] : memref<32x256xbf16, #tpu.memory_space<vmem>>, vector<32x256xbf16>
    %cst = arith.constant dense<0.000000e+00> : vector<8x256xf32>
    %7 = tpu.matmul %5, %6, %cst {dimension_numbers = #tpu.dot_dimension_numbers<[1], [0], [0], [1], [0, 0, 1, 1], [], []>} : vector<8x32xbf16>, vector<32x256xbf16>, vector<8x256xf32> -> vector<8x256xf32>
    %c0_5 = arith.constant 0 : index
    %c0_6 = arith.constant 0 : index
    %8 = vector.load %arg8[%c0_5, %c0_6] : memref<1x256xf32, #tpu.memory_space<vmem>>, vector<1x256xf32>
    %9 = vector.broadcast %8 : vector<1x256xf32> to vector<8x256xf32>
    %10 = arith.addf %7, %9 : vector<8x256xf32>
    %11 = vector.extract_strided_slice %10 {offsets = [0, 0], sizes = [8, 128], strides = [1, 1]} : vector<8x256xf32> to vector<8x128xf32>
    %12 = arith.truncf %11 : vector<8x128xf32> to vector<8x128xbf16>
    %13 = vector.extract_strided_slice %10 {offsets = [0, 128], sizes = [8, 128], strides = [1, 1]} : vector<8x256xf32> to vector<8x128xf32>
    %14 = arith.truncf %13 : vector<8x128xf32> to vector<8x128xbf16>
    %c0_7 = arith.constant 0 : index
    %c0_8 = arith.constant 0 : index
    %15 = vector.load %arg10[%c0_7, %c0_8] : memref<8x128xbf16, #tpu.memory_space<vmem>>, vector<8x128xbf16>
    %cst_9 = arith.constant dense<0.000000e+00> : vector<8x8xf32>
    %16 = tpu.matmul %15, %12, %cst_9 {dimension_numbers = #tpu.dot_dimension_numbers<[1], [1], [0], [0], [0, 0, 1, 0], [], []>} : vector<8x128xbf16>, vector<8x128xbf16>, vector<8x8xf32> -> vector<8x8xf32>
    %c0_10 = arith.constant 0 : index
    %c0_11 = arith.constant 0 : index
    %17 = vector.load %arg11[%c0_10, %c0_11] : memref<8x1xf32, #tpu.memory_space<vmem>>, vector<8x1xf32>
    %cst_12 = arith.constant dense<0xFF800000> : vector<8xf32>
    %18 = vector.multi_reduction <maximumf>, %16, %cst_12 [1] : vector<8x8xf32> to vector<8xf32>
    %19 = vector.shape_cast %18 : vector<8xf32> to vector<8x1xf32>
    %20 = arith.maximumf %17, %19 : vector<8x1xf32>
    %c0_13 = arith.constant 0 : index
    %c0_14 = arith.constant 0 : index
    %21 = vector.load %arg11[%c0_13, %c0_14] : memref<8x1xf32, #tpu.memory_space<vmem>>, vector<8x1xf32>
    %22 = arith.subf %21, %20 : vector<8x1xf32>
    %23 = math.exp %22 : vector<8x1xf32>
    %24 = vector.broadcast %20 : vector<8x1xf32> to vector<8x8xf32>
    %25 = arith.subf %16, %24 : vector<8x8xf32>
    %26 = math.exp %25 : vector<8x8xf32>
    %c0_15 = arith.constant 0 : index
    %c0_16 = arith.constant 0 : index
    %27 = vector.load %arg12[%c0_15, %c0_16] : memref<8x1xf32, #tpu.memory_space<vmem>>, vector<8x1xf32>
    %28 = arith.mulf %23, %27 : vector<8x1xf32>
    %cst_17 = arith.constant dense<0.000000e+00> : vector<8xf32>
    %29 = vector.multi_reduction <add>, %26, %cst_17 [1] : vector<8x8xf32> to vector<8xf32>
    %30 = vector.shape_cast %29 : vector<8xf32> to vector<8x1xf32>
    %31 = arith.addf %28, %30 : vector<8x1xf32>
    %c0_18 = arith.constant 0 : index
    %c0_19 = arith.constant 0 : index
    %32 = vector.load %arg12[%c0_18, %c0_19] : memref<8x1xf32, #tpu.memory_space<vmem>>, vector<8x1xf32>
    tpu.vector_store %arg12[%c0_18, %c0_19], %31 {strides = array<i32>} : memref<8x1xf32, #tpu.memory_space<vmem>>, vector<8x1xf32>,
    %c0_20 = arith.constant 0 : index
    %c0_21 = arith.constant 0 : index
    %33 = vector.load %arg13[%c0_20, %c0_21] : memref<8x128xf32, #tpu.memory_space<vmem>>, vector<8x128xf32>
    %34 = vector.broadcast %23 : vector<8x1xf32> to vector<8x128xf32>
    %35 = arith.mulf %34, %33 : vector<8x128xf32>
    %36 = arith.truncf %26 : vector<8x8xf32> to vector<8x8xbf16>
    %cst_22 = arith.constant dense<0.000000e+00> : vector<8x128xf32>
    %37 = tpu.matmul %36, %14, %cst_22 {dimension_numbers = #tpu.dot_dimension_numbers<[1], [0], [0], [1], [0, 0, 1, 1], [], []>} : vector<8x8xbf16>, vector<8x128xbf16>, vector<8x128xf32> -> vector<8x128xf32>
    %38 = arith.addf %35, %37 : vector<8x128xf32>
    %c0_23 = arith.constant 0 : index
    %c0_24 = arith.constant 0 : index
    %39 = vector.load %arg13[%c0_23, %c0_24] : memref<8x128xf32, #tpu.memory_space<vmem>>, vector<8x128xf32>
    tpu.vector_store %arg13[%c0_23, %c0_24], %38 {strides = array<i32>} : memref<8x128xf32, #tpu.memory_space<vmem>>, vector<8x128xf32>,
    %c0_25 = arith.constant 0 : index
    %c0_26 = arith.constant 0 : index
    %40 = vector.load %arg11[%c0_25, %c0_26] : memref<8x1xf32, #tpu.memory_space<vmem>>, vector<8x1xf32>
    tpu.vector_store %arg11[%c0_25, %c0_26], %20 {strides = array<i32>} : memref<8x1xf32, #tpu.memory_space<vmem>>, vector<8x1xf32>,
    %c0_i32_27 = arith.constant 0 : i32
    %41 = arith.cmpi eq, %arg2, %c0_i32_27 : i32
    %42 = arith.extui %41 : i1 to i32
    %c0_i32_28 = arith.constant 0 : i32
    %43 = arith.cmpi ne, %42, %c0_i32_28 : i32
    scf.if %43 {
      %c0_29 = arith.constant 0 : index
      %c0_30 = arith.constant 0 : index
      %44 = vector.load %arg12[%c0_29, %c0_30] : memref<8x1xf32, #tpu.memory_space<vmem>>, vector<8x1xf32>
      %45 = tpu.reciprocal %44 {approx = true} : vector<8x1xf32> -> vector<8x1xf32>
      %c0_31 = arith.constant 0 : index
      %c0_32 = arith.constant 0 : index
      %46 = vector.load %arg13[%c0_31, %c0_32] : memref<8x128xf32, #tpu.memory_space<vmem>>, vector<8x128xf32>
      %47 = vector.broadcast %45 : vector<8x1xf32> to vector<8x128xf32>
      %48 = arith.mulf %46, %47 : vector<8x128xf32>
      %c0_33 = arith.constant 0 : index
      %c0_34 = arith.constant 0 : index
      %c0_35 = arith.constant 0 : index
      %49 = vector.load %arg9[%c0_33, %c0_34, %c0_35] : memref<1x8x128xf32, #tpu.memory_space<vmem>>, vector<1x8x128xf32>
      %50 = vector.shape_cast %49 : vector<1x8x128xf32> to vector<8x128xf32>
      %51 = vector.shape_cast %48 : vector<8x128xf32> to vector<1x8x128xf32>
      tpu.vector_store %arg9[%c0_33, %c0_34, %c0_35], %51 {strides = array<i32>} : memref<1x8x128xf32, #tpu.memory_space<vmem>>, vector<1x8x128xf32>,
    } else {
    }
    return
  }
  func.func @transform_0(%arg0: i32, %arg1: i32, %arg2: i32) -> (i32, i32, i32) {
    %c0_i32 = arith.constant 0 : i32
    %c0_i32_0 = arith.constant 0 : i32
    return %arg0, %arg1, %c0_i32 : i32, i32, i32
  }
  func.func @transform_1(%arg0: i32, %arg1: i32, %arg2: i32) -> (i32, i32, i32) {
    %c0_i32 = arith.constant 0 : i32
    %c0_i32_0 = arith.constant 0 : i32
    return %arg0, %arg2, %c0_i32 : i32, i32, i32
  }
  func.func @transform_2(%arg0: i32, %arg1: i32, %arg2: i32) -> (i32, i32) {
    %c0_i32 = arith.constant 0 : i32
    %c0_i32_0 = arith.constant 0 : i32
    %c0_i32_1 = arith.constant 0 : i32
    return %c0_i32, %c0_i32_0 : i32, i32
  }
  func.func @transform_3(%arg0: i32, %arg1: i32, %arg2: i32) -> (i32, i32) {
    %c0_i32 = arith.constant 0 : i32
    %c0_i32_0 = arith.constant 0 : i32
    %c0_i32_1 = arith.constant 0 : i32
    return %c0_i32, %c0_i32_0 : i32, i32
  }
  func.func @transform_4(%arg0: i32, %arg1: i32, %arg2: i32) -> (i32, i32) {
    %c0_i32 = arith.constant 0 : i32
    %c0_i32_0 = arith.constant 0 : i32
    %c0_i32_1 = arith.constant 0 : i32
    return %c0_i32, %c0_i32_0 : i32, i32
  }
  func.func @transform_5(%arg0: i32, %arg1: i32, %arg2: i32) -> (i32, i32) {
    %c0_i32 = arith.constant 0 : i32
    %c0_i32_0 = arith.constant 0 : i32
    %c0_i32_1 = arith.constant 0 : i32
    return %c0_i32, %c0_i32_0 : i32, i32
  }
  func.func @transform_6(%arg0: i32, %arg1: i32, %arg2: i32) -> (i32, i32, i32) {
    %c0_i32 = arith.constant 0 : i32
    %c0_i32_0 = arith.constant 0 : i32
    return %arg0, %arg1, %c0_i32 : i32, i32, i32
  }
}

</mosaic_0001>

<bundles_post_ra>
// kernel: tpu_custom_call.1
= control target key start
LH: loop header
LB: loop body
LE: loop exit
PB: predicated region body
PF: predicated region fallthrough
CT: control target
= control target key end

     0   :  { %s1546_s0 = inlined_call_operand.hbm [shape: f32[2,8,32], index: 0, kind: input, shape index: {}]   ;;  %s1547_s1 = inlined_call_operand.hbm [shape: f32[2,8,32], index: 1, kind: input, shape index: {}]   ;;  %s1548_s2 = inlined_call_operand.hbm [shape: bf16[32,128], index: 2, kind: input, shape index: {}]   ;;  %s1549_s3 = inlined_call_operand.hbm [shape: bf16[32,256], index: 3, kind: input, shape index: {}]   ;;  %s1550_s4 = inlined_call_operand.vmem [shape: f32[1,128], index: 4, kind: input, shape index: {}]   ;;  %s1551_s5 = inlined_call_operand.vmem [shape: f32[1,256], index: 5, kind: input, shape index: {}]   ;;  %s1552_s6 = inlined_call_operand.hbm [shape: f32[2,8,128], index: 6, kind: output, shape index: {}]  }
   0x1   :  { %1559 = sst [smem:[#allocation23_spill]] %s1548_s2 }
   0x2   :  { %1560 = sst [smem:[#allocation24_spill]] %s1549_s3 }
   0x3   :  { %11 = vsyncpa [#allocation7], 0 }
   0x4   :  { %13 = vsyncpa [#allocation7 + $0x1], 0 }
   0x5   :  { %14 = vsyncpa [#allocation10], 0 }
   0x6   :  { %16 = vsyncpa [#allocation10 + $0x1], 0 }
   0x7   :  { %17 = vsyncpa [#allocation13], 0 }
   0x8   :  { %18 = vsyncpa [#allocation8], 0 }
   0x9   :  { %20 = vsyncpa [#allocation8 + $0x1], 0  ;;  %s1233_s21 = smov 0   ;;  %s1235_s22 = smov 0  }
   0xa   :  { %s1237_s23 = smov 0   ;;  %s1239_s24 = smov 0  }
   0xb   :  { %s1241_s25 = smov 0   ;;  %s1243_s26 = smov 0  }
   0xc LB: > { %1561 = sst [smem:[#allocation20_spill]] %s1179_s25  ;;  %s1264_s27 = sadd.s32 4294967295, %s1183_s26   ;;  %s1183_s26 = sphi %s1243_s26, %s26_s26   ;;  %s1179_s25 = sphi %s1241_s25, %s1584_s25   ;;  %s1175_s24 = sphi %s1239_s24, %s1583_s24   ;;  %s1171_s23 = sphi %s1237_s23, %s1587_s23   ;;  %s1167_s22 = sphi %s1235_s22, %s1586_s22   ;;  %s1163_s21 = sphi %s1233_s21, %s1585_s21  }
   0xd   : > { %s805_s28 = sadd.s32 4294967294, %s1183_s26   ;;  %p67_p0 = scmp.ne.s32.totalorder %s1167_s22, %s1163_s21 }
   0xe   : > { %p1553_p1 = scmp.eq.s32.totalorder %s1264_s27, 0  ;;  %p211_p3 = scmp.eq.s32.totalorder %s805_s28, 1 }
   0xf   : > { %p806_p5 = scmp.ge.s32.totalorder %s1183_s26, 1  ;;  %p218_p7 = scmp.lt.s32.totalorder %s1183_s26, 3 }
  0x10   : > { %p1273_p4 = por %p1553_p1, %p67_p0  ;;  %p1278_p6 = por %p211_p3, %p67_p0 }
  0x11   : > { %p1283_p8 = pnand %p806_p5, %p218_p7  ;;  %s1185_s8 = smov [#allocation11]  }
  0x12   : > { %s1562_s29 = scalar_select %p1273_p4, 1, 0 }
  0x13   : > { %s1563_s30 = scalar_select %p1278_p6, 1, 0 }
  0x14   : > { %s1564_s7 = scalar_select %p1283_p8, 1, 0 }
  0x15   : > { %s230_s9 = sshll.u32 %s1185_s8, 4  ;;  %p875_p9 = pneg %p1283_p8  ;;  %s1287_s9 = int_to_ptr.vmem [resolvable:$true] %s230_s9 }
  0x16   : > { %s1186_s11 = smov [#allocation12]   ;;  %s1566_s2 = sld [smem:[#allocation23_spill]] }
  0x17   : > { %p1294_p11 = pnand %p875_p9, %p1553_p1  ;;  %s243_s12 = sshll.u32 %s1186_s11, 4  ;;  %s1298_s12 = int_to_ptr.vmem [resolvable:$true] %s243_s12 }
  0x19   : > { %p975_p13 = pneg %p1294_p11 }
  0x1c   : > { %s973_s15 = scalar_lea.hbm %s1566_s2, 256 }
  0x1d   : > { %p974_p12 = scmp.ne.s32.totalorder %s1566_s2, %s973_s15  ;;  %p980_p5 = scmp.lt.u32.totalorder %s973_s15, %s1566_s2 }
  0x1f   : > { %p976_p0 = pnand %p975_p13, %p974_p12 }
  0x21   : > { %p977_p3 = pneg %p976_p0 }
  0x23   : > { %p982_p7 = pnand %p980_p5, %p977_p3 }
  0x25   : > { %985 = shalt.err (!%p982_p7)
}
  0x26   : > { %s986_s20 = scalar_lea.vmem %s1287_s9, 256  ;;  %p994_p2 = scmp.lt.s32.totalorder %s1287_s9, %s1287_s9 }
  0x27   : > { %p987_p9 = scmp.ne.s32.totalorder %s1287_s9, %s986_s20  ;;  %p995_p12 = scmp.lt.s32.totalorder %s986_s20, %s986_s20 }
  0x29   : > { %p989_p10 = pnand %p987_p9, %p975_p13  ;;  %p996_p0 = por %p995_p12, %p994_p2 }
  0x2b   : > { %p990_p1 = pneg %p989_p10 }
  0x2d   : > { %p997_p6 = pnand %p996_p0, %p990_p1 }
  0x2f   : > { %1000 = shalt.err (!%p997_p6)
}
  0x30   : > { %s1187_s28 = smov 64   ;;  %s1188_s8 = smov 4  }
  0x31   : > { %878 = dma.hbm_to_vmem [thread:$0]  (!%p1294_p11), %s1566_s2, 256, %s1287_s9, [#allocation10], %s1187_s28, %s1187_s28, %s1188_s8  }
  0x32   : > { %s1567_s3 = sld [smem:[#allocation24_spill]] }
  0x38   : > { %s1001_s16 = scalar_lea.hbm %s1567_s3, 512 }
  0x39   : > { %p1002_p2 = scmp.ne.s32.totalorder %s1567_s3, %s1001_s16  ;;  %p1008_p10 = scmp.lt.u32.totalorder %s1001_s16, %s1567_s3 }
  0x3b   : > { %p1004_p1 = pnand %p1002_p2, %p975_p13 }
  0x3d   : > { %p1005_p6 = pneg %p1004_p1 }
  0x3f   : > { %p1010_p3 = pnand %p1008_p10, %p1005_p6 }
  0x41   : > { %1013 = shalt.err (!%p1010_p3)
}
  0x42   : > { %s1014_s9 = scalar_lea.vmem %s1298_s12, 512  ;;  %p1022_p12 = scmp.lt.s32.totalorder %s1298_s12, %s1298_s12 }
  0x43   : > { %p1015_p5 = scmp.ne.s32.totalorder %s1298_s12, %s1014_s9  ;;  %p1023_p0 = scmp.lt.s32.totalorder %s1014_s9, %s1014_s9 }
  0x45   : > { %p1017_p7 = pnand %p1015_p5, %p975_p13  ;;  %p1024_p2 = por %p1023_p0, %p1022_p12 }
  0x47   : > { %p1018_p9 = pneg %p1017_p7 }
  0x49   : > { %p1025_p1 = pnand %p1024_p2, %p1018_p9 }
  0x4b   : > { %1028 = shalt.err (!%p1025_p1)
}
  0x4c   : > { %s1189_s28 = smov 128   ;;  %s1190_s8 = smov 8  }
  0x4d   : > { %881 = dma.hbm_to_vmem [thread:$0]  (!%p1294_p11), %s1567_s3, 512, %s1298_s12, [#allocation13], %s1189_s28, %s1189_s28, %s1190_s8  }
  0x4e   : > { %s45_s14 = sadd.s32 1, %s1179_s25  ;;  %s54_s15 = sadd.s32 1, %s1171_s23 }
  0x4f   : > { %p47_p13 = scmp.ge.s32.totalorder %s45_s14, 2  ;;  %p61_p6 = scmp.ne.s32.totalorder %s1171_s23, %s1167_s22 }
  0x50   : > { %p62_p10 = scmp.eq.s32.totalorder %s1183_s26, 0  ;;  %p895_p3 = scmp.lt.s32.totalorder %s1183_s26, 2 }
  0x51   : > { %s1589_s14 = smov (%p47_p13, %s45_s14), 0  ;;  %p1569_p7 = scmp.eq.s32.totalorder %s1264_s27, 1 }
  0x52   : > { %1568 = sst [smem:[#allocation21_spill]] %s1589_s14  ;;  %p63_p5 = por %p62_p10, %p61_p6 }
  0x53   : > { %p1362_p9 = por %p1569_p7, %p61_p6  ;;  %s49_s10 = ssub.s32 %s1179_s25, %s1589_s14 }
  0x54   : > { %s263_s17 = sand.u32 1, %s1171_s23   ;;  %p52_p12 = scmp.eq.s32.totalorder %s49_s10, 0 }
  0x55   : > { %s1570_s16 = scalar_select %p1362_p9, 1, 0 }
  0x56   : > { %s1369_s12 = sshll.u32 %s263_s17, 3  ;;  %s811_s18 = sshll.u32 %s1179_s25, 7 }
  0x57   : > { %s1373_s19 = scalar_select %p52_p12, %s1171_s23, %s54_s15  }
  0x58   : > { %s1378_s28 = scalar_lea.hbm %s1546_s0, %s811_s18  ;;  %s267_s8 = scalar_lea.vmem [#allocation6], %s1369_s12 }
  0x59   : > { %1571 = sst [smem:[#allocation22_spill]] %s1373_s19  ;;  %s275_s11 = sshll.u32 %s267_s8, 4  ;;  %s1387_s11 = int_to_ptr.vmem [resolvable:$true] %s275_s11 }
  0x5a   : > { %p1383_p11 = pnand %p895_p3, %p63_p5  ;;  %s1392_s20 = scalar_lea.hbm %s1547_s1, %s811_s18 }
  0x5b   : > { %s264_s9 = scalar_lea.sflag [#allocation7], %s263_s17  ;;  %s1029_s2 = scalar_lea.hbm %s1378_s28, 128 }
  0x5c   : > { %p1030_p0 = scmp.ne.s32.totalorder %s1378_s28, %s1029_s2  ;;  %p1031_p2 = pneg %p1383_p11 }
  0x5d   : > { %s1034_s14 = scalar_lea.hbm %s1546_s0, 256  ;;  %p1035_p6 = scmp.lt.u32.totalorder %s1378_s28, %s1546_s0 }
  0x5e   : > { %p1032_p1 = pnand %p1031_p2, %p1030_p0  ;;  %p1036_p10 = scmp.lt.u32.totalorder %s1034_s14, %s1029_s2 }
  0x5f   : > { %p1038_p5 = scmp.lt.u32.totalorder %s1029_s2, %s1378_s28 }
  0x60   : > { %p1033_p13 = pneg %p1032_p1  ;;  %p1037_p3 = por %p1036_p10, %p1035_p6 }
  0x62   : > { %p1039_p7 = por %p1038_p5, %p1037_p3 }
  0x64   : > { %p1040_p12 = pnand %p1039_p7, %p1033_p13 }
  0x66   : > { %1043 = shalt.err (!%p1040_p12)
}
  0x67   : > { %s1044_s17 = scalar_lea.vmem %s1387_s11, 128  ;;  %s1191_s3 = smov [#allocation6]  }
  0x68   : > { %p1045_p0 = scmp.ne.s32.totalorder %s1387_s11, %s1044_s17  ;;  %s1049_s18 = sshll.u32 %s1191_s3, 4  ;;  %s1050_s18 = int_to_ptr.vmem [resolvable:$false] %s1049_s18 }
  0x69   : > { %s1051_s25 = scalar_lea.vmem %s1050_s18, 256  ;;  %p1052_p4 = scmp.lt.s32.totalorder %s1387_s11, %s1050_s18 }
  0x6a   : > { %p1047_p1 = pnand %p1045_p0, %p1031_p2  ;;  %p1053_p6 = scmp.lt.s32.totalorder %s1051_s25, %s1044_s17 }
  0x6c   : > { %p1048_p9 = pneg %p1047_p1  ;;  %p1054_p10 = por %p1053_p6, %p1052_p4 }
  0x6e   : > { %p1055_p3 = pnand %p1054_p10, %p1048_p9 }
  0x70   : > { %1058 = shalt.err (!%p1055_p3)
}
  0x71   : > { %885 = dma.hbm_to_vmem [thread:$0]  (!%p1383_p11), %s1378_s28, 128, %s1387_s11, %s264_s9  }
  0x72   : > { %s282_s2 = sand.u32 1, %s1183_s26   ;;  %s286_s14 = scalar_lea.vmem [#allocation9], %s1369_s12 }
  0x73   : > { %s294_s19 = sshll.u32 %s286_s14, 4  ;;  %s283_s15 = scalar_lea.sflag [#allocation10], %s282_s2  ;;  %s295_s19 = int_to_ptr.vmem [resolvable:$true] %s294_s19 }
  0x74   : > { %s1059_s10 = scalar_lea.hbm %s1392_s20, 128  ;;  %s1064_s3 = scalar_lea.hbm %s1547_s1, 256 }
  0x75   : > { %p1060_p4 = scmp.ne.s32.totalorder %s1392_s20, %s1059_s10  ;;  %p1065_p5 = scmp.lt.u32.totalorder %s1392_s20, %s1547_s1 }
  0x76   : > { %p1066_p7 = scmp.lt.u32.totalorder %s1064_s3, %s1059_s10  ;;  %p1068_p0 = scmp.lt.u32.totalorder %s1059_s10, %s1392_s20 }
  0x77   : > { %p1062_p9 = pnand %p1060_p4, %p1031_p2 }
  0x78   : > { %p1067_p12 = por %p1066_p7, %p1065_p5 }
  0x79   : > { %p1063_p13 = pneg %p1062_p9 }
  0x7a   : > { %p1069_p1 = por %p1068_p0, %p1067_p12 }
  0x7c   : > { %p1070_p6 = pnand %p1069_p1, %p1063_p13 }
  0x7e   : > { %1073 = shalt.err (!%p1070_p6)
}
  0x7f   : > { %s1074_s12 = scalar_lea.vmem %s295_s19, 128  ;;  %s1192_s28 = smov [#allocation9]  }
  0x80   : > { %p1075_p10 = scmp.ne.s32.totalorder %s295_s19, %s1074_s12  ;;  %s1079_s11 = sshll.u32 %s1192_s28, 4  ;;  %s1080_s11 = int_to_ptr.vmem [resolvable:$false] %s1079_s11 }
  0x81   : > { %s1081_s9 = scalar_lea.vmem %s1080_s11, 256  ;;  %p1082_p9 = scmp.lt.s32.totalorder %s295_s19, %s1080_s11 }
  0x82   : > { %p1077_p3 = pnand %p1075_p10, %p1031_p2  ;;  %p1083_p8 = scmp.lt.s32.totalorder %s1081_s9, %s1074_s12 }
  0x84   : > { %p1078_p4 = pneg %p1077_p3  ;;  %p1084_p5 = por %p1083_p8, %p1082_p9 }
  0x86   : > { %p1085_p7 = pnand %p1084_p5, %p1078_p4 }
  0x88   : > { %1088 = shalt.err (!%p1085_p7)
}
  0x89   : > { %888 = dma.hbm_to_vmem [thread:$0]  (!%p1383_p11), %s1392_s20, 128, %s295_s19, %s283_s15  }
  0x8a   : > { %p1573_p13 = scmp.ne.s32.totalorder %s1564_s7, 0 }
  0x8b   : > { %s1443_s2 = sand.u32 (!%p1573_p13), 1, %s1167_s22   ;;  %p1574_p8 = scmp.ne.s32.totalorder (!%p1573_p13), %s1562_s29, 0 }
  0x8c   : > { %303 = sbr.rel (%p1573_p13) target bundleno = 1202 (0x4b2), region = 44  ;;  %s1446_s14 = sshll.u32 (!%p1573_p13), %s1443_s2, 3 }
  0x8d   : > { %s306_s10 = scalar_lea.sflag (!%p1573_p13), [#allocation7], %s1443_s2  ;;  %s309_s8 = scalar_lea.vmem (!%p1573_p13), [#allocation6], %s1446_s14 }
  0x93   : > { %1142 = dma.done.wait (%p1574_p8), %s306_s10, 128  }
  0x94   : > { %1144 = vsyncadd (%p1574_p8), %s306_s10, 4294967168  ;;  %s314_s7 = sand.u32 1, %s1264_s27   ;;  %s318_s20 = scalar_lea.vmem [#allocation9], %s1446_s14 }
  0x95   : > { %s315_s13 = scalar_lea.sflag [#allocation10], %s314_s7 }
  0x96   : > { %1146 = dma.done.wait (%p1574_p8), %s315_s13, 128  }
  0x97   : > { %1148 = vsyncadd (%p1574_p8), %s315_s13, 4294967168  ;;  %p1575_p11 = scmp.eq.s32.totalorder %s1264_s27, 0 }
  0x99   : > { %1150 = dma.done.wait (%p1575_p11), [#allocation10], 256   ;;  %p1576_p2 = pmov %p1575_p11 }
  0x9b   : > { %1152 = vsyncadd (%p1576_p2), [#allocation10], 4294967040  ;;  %p1577_p12 = pmov %p1576_p2 }
  0x9c   : > { %p1578_p0 = pmov %p1576_p2 }
  0x9d   : > { %1154 = dma.done.wait (%p1577_p12), [#allocation13], 512  }
  0x9e   : > { %1156 = vsyncadd (%p1578_p0), [#allocation13], 4294966784  ;;  %v1193_v0 = vmov 0.0   ;;  %vm1194_vm0 = vmmov 0   ;;  %v1195_v1 = vmov 0   ;;  %v959_v2 = vld [vmem:[#allocation11] sm:$0xff]   ;;  %v449_v12 = vlaneseq }
  0x9f   : > { %841 = vmatprep.subr.bf16.mxu0 %v1193_v0  ;;  %845 = vmatprep.mubr.msk.bf16.mxu0 %vm1194_vm0, %v1193_v0  ;;  %v960_v3 = vld [vmem:[#allocation12 + $0x4] ss:$8 sps:$4 sm:$0xff]   ;;  %v962_v4 = vld [vmem:[#allocation12] ss:$8 sps:$4 sm:$0xff]   ;;  %v963_v5 = vld [vmem:[#allocation11 + $0x8] sm:$0xff]   ;;  %vm390_vm1 = vcmask 261120  }
  0xa0   : > { %515 = vmatprep.mubr.bf16.mxu1 %v1195_v1  ;;  %957 = vset.pattern.permute.xlu0 %v1195_v1  ;;  %v964_v6 = vld [vmem:[#allocation12 + $0x14] ss:$8 sps:$4 sm:$0xff]   ;;  %v966_v7 = vld [vmem:[#allocation12 + $0x10] ss:$8 sps:$4 sm:$0xff]   ;;  %v441_v10 = vld [vmem:[%s318_s20] sm:$0xff]  ;;  %v450_v13 = vshrl.u32 %v449_v12, 7 }
  0xa1   : > { %958 = vset.pattern.permute.xlu1 %v1195_v1  ;;  %842 = vmatpush3.bf16.msra.mxu0 %v959_v2  ;;  %v365_v8 = vld [vmem:[%s309_s8] sm:$0xff]  ;;  %v442_v11 = vpack.c.bf16 %v441_v10, %v441_v10  ;;  %vm603_vm2 = vcmask 1043456   ;;  %vm437_vm3 = vcmask 7168   ;;  %v1196_v37 = vmov -inf   ;;  %s831_s17 = sshll.u32 %s1175_s24, 7  ;;  %s359_s3 = scalar_lea.vmem [#allocation14], %s1446_s14 }
  0xa2   : > { %483 = vmatprep.subr.bf16.mxu1 %v960_v3  ;;  %843 = vmatprep.subr.bf16.mxu0 %v1193_v0  ;;  %v366_v9 = vpack.c.bf16 %v365_v8, %v365_v8  ;;  %v451_v14 = vsub.s32 0, %v450_v13  ;;  %v447_v15 = vld [vmem:[%s1551_s5] sm:$0x3]  ;;  %v455_v16 = vsub.s32 1, %v450_v13  ;;  %438 = vst.msk [vmem:[#allocation3] sm:$0xff] %vm437_vm3, %v1196_v37  ;;  %439 = vst.msk [vmem:[#allocation4] sm:$0xff] %vm437_vm3, %v1193_v0  ;;  %s1497_s28 = scalar_lea.hbm %s1552_s6, %s831_s17 }
  0xa3   : > { %484 = vmatpush1.bf16.msra.mxu1 %v962_v4  ;;  %v820_v17 = vld [vmem:[%s1550_s4] ss:$0 sm:$0xff]  ;;  %vm568_vm4 = vcmask 64512   ;;  %s678_s18 = sshll.u32 %s359_s3, 4  ;;  %s664_s11 = scalar_lea.sflag [#allocation8], %s1443_s2  ;;  %s1499_s18 = int_to_ptr.vmem [resolvable:$true] %s678_s18 }
  0xa4   : > { %485 = vmatprep.subr.bf16.mxu1 %v964_v6  ;;  %v452_v18 = vrot.slane %v447_v15, %v451_v14  ;;  %v456_v20 = vrot.slane %v447_v15, %v455_v16  ;;  %s1089_s9 = scalar_lea.vmem %s1499_s18, 128  ;;  %p1579_p6 = scmp.ne.s32.totalorder %s1570_s16, 0 }
  0xa5   : > { %844 = vmatpush3.bf16.msra.mxu0 %v963_v5  ;;  %p1090_p1 = scmp.ne.s32.totalorder %s1499_s18, %s1089_s9  ;;  %s1197_s24 = smov [#allocation14]  }
  0xa6   : > { %849 = vmatprep.subr.bf16.mxu0 %v1193_v0  ;;  %s1093_s14 = sshll.u32 %s1197_s24, 4  ;;  %s1094_s14 = int_to_ptr.vmem [resolvable:$false] %s1093_s14 }
  0xa7   : > { %486 = vmatpush1.bf16.msra.mxu1 %v966_v7  ;;  %p1091_p10 = pnand %p1090_p1, %p1579_p6  ;;  %s1095_s10 = scalar_lea.vmem %s1094_s14, 256 }
  0xa8   : > { %846 = vmatmul.mubr.msk.bf16.vlgmr.msra.gmra.mrb[0].mxu0 %vm390_vm1, %v366_v9  ;;  %855 = vmatprep.subr.bf16.mxu1 %v1193_v0  ;;  %p1096_p4 = scmp.lt.s32.totalorder %s1499_s18, %s1094_s14  ;;  %p1097_p9 = scmp.lt.s32.totalorder %s1095_s10, %s1089_s9 }
  0xa9   : > { %851 = vmatprep.mubr.msk.bf16.mxu0 %vm1194_vm0, %v1193_v0  ;;  %v567_v43 = vld [vmem:[#allocation3] sm:$0xff]  ;;  %v584_v55 = vld [vmem:[#allocation4] sm:$0xff]  ;;  %p1092_p3 = pneg %p1091_p10 }
  0xaa   : > { %828 = vmatmul.mubr.msk.bf16.vlgmr.msra.gmra.mrb[0].mxu1 %vm390_vm1, %v442_v11  ;;  %p1098_p5 = por %p1097_p9, %p1096_p4 }
  0xab   : > { %857 = vmatprep.mubr.msk.bf16.mxu1 %vm1194_vm0, %v1193_v0 }
  0xac   : > { %p1099_p7 = pnand %p1098_p5, %p1092_p3 }
 0x17b   : > { %v428_v19 = vpop.f32.mrb[0].mxu0 }
 0x17c   : > { %v429_v21 = vadd.f32 %v820_v17, %v428_v19  ;;  %v847_v22 = vpop.f32.mrb[1].mxu0 }
 0x17d   : > { %v517_v23 = vpop.f32.mrb[0].mxu1  ;;  %v431_v24 = vpop.f32.mrb[2].mxu0 }
 0x17e   : > { %v434_v25 = vmul.f32 0.17677669, %v429_v21  ;;  %v518_v26 = vadd.f32 %v517_v23, %v452_v18  ;;  %v519_v27 = vpop.f32.mrb[1].mxu1  ;;  %v848_v28 = vpop.f32.mrb[3].mxu0 }
 0x17f   : > { %v520_v29 = vadd.f32 %v519_v27, %v456_v20  ;;  %v521_v30 = vpop.f32.mrb[2].mxu1 }
 0x180   : > { %v435_v31 = vpack.c.bf16 %v434_v25, %v434_v25  ;;  %v524_v32 = vpack.c.bf16 %v518_v26, %v518_v26  ;;  %v522_v33 = vpop.f32.mrb[3].mxu1 }
 0x181   : > { %v525_v34 = vpack.c.bf16 %v520_v29, %v520_v29 }
 0x182   : > { %436 = vst [vmem:[#allocation2] sm:$0xf] %v435_v31  ;;  %850 = vmatpush3.bf16.xpose.msra.mxu0 %v524_v32 }
 0x183   : > { %v605_v35 = vsel %vm603_vm2, %v525_v34, 0 }
 0x184   : > { %856 = vmatpush3.bf16.msra.mxu1 %v605_v35 }
 0x189   : > { %v526_v36 = vld [vmem:[#allocation2] sm:$0xf] }
 0x18a   : > { %852 = vmatmul.mubr.bf16.vlgmr.msra.gmra.mrb[4].mxu0 %v526_v36 }
 0x25d   : > { %v561_v38 = vpop.f32.mrb[4].mxu0 }
 0x25e   : > { %v853_v39 = vpop.f32.mrb[5].mxu0  ;;  %v569_v40 = vsel %vm568_vm4, %v561_v38, -inf }
 0x25f   : > { %570 = vmax.xlane.f32.xlu0 %v569_v40  ;;  %v564_v41 = vpop.f32.mrb[6].mxu0 }
 0x260   : > { %v854_v42 = vpop.f32.mrb[7].mxu0 }
 0x2ec   : > { %v571_v44 = vpop.xlane.xlu0 %570 }
 0x2ed   : > { %v572_v45 = vmax.f32 %v567_v43, %v571_v44 }
 0x2ef   : > { %v573_v46 = vsub.f32 %v567_v43, %v572_v45  ;;  %649 = vst.msk [vmem:[#allocation3] sm:$0xff] %vm437_vm3, %v572_v45  ;;  %578 = vperm.xlu0 %957, %v572_v45  }
 0x2f1   : > { %v574_v53 = vmul.f32 1.442695, %v573_v46 }
 0x36e   : > { %v579_v47 = vpop.permute.xlu0 %578 }
 0x36f   : > { %v581_v48 = vsub.f32 %v561_v38, %v579_v47 }
 0x371   : > { %v582_v49 = vmul.f32 1.442695, %v581_v48 }
 0x373   : > { %967 = vpow2.f32 %v582_v49 }
 0x374   : > { %969 = vpow2.f32 %v574_v53 }
 0x37d   : > { %v968_v50 = vpop.eup %967 }
 0x37e   : > { %v586_v51 = vsel %vm568_vm4, %v968_v50, 0.0  ;;  %v599_v52 = vpack.c.bf16 %v968_v50, %v968_v50  ;;  %v970_v54 = vpop.eup %969 }
 0x37f   : > { %587 = vadd.xlane.f32.xlu1 %v586_v51  ;;  %v585_v56 = vmul.f32 %v970_v54, %v584_v55 }
 0x380   : > { %858 = vmatmul.mubr.msk.bf16.vlgmr.msra.gmra.mrb[4].mxu1 %vm568_vm4, %v599_v52 }
 0x390   : > { %595 = vperm.xlu1 %958, %v970_v54  }
 0x40c   : > { %v588_v57 = vpop.xlane.xlu1 %587 }
 0x40d   : > { %v589_v58 = vadd.f32 %v588_v57, %v585_v56 }
 0x40f   : > { %591 = vst.msk [vmem:[#allocation4] sm:$0xff] %vm437_vm3, %v589_v58 }
 0x410   : > { %v596_v1 = vpop.permute.xlu1 %595 }
 0x411   : > { %v598_v2 = vmul.f32 0.0, %v596_v1 }
 0x416   : > { %v653_v59 = vld [vmem:[#allocation4] sm:$0xff] }
 0x417   : > { %971 = vrcp.f32 %v653_v59 }
 0x421   : > { %v972_v60 = vpop.eup %971 }
 0x422   : > { %658 = vperm.xlu1 %958, %v972_v60  }
 0x453   : > { %v641_v61 = vpop.f32.mrb[4].mxu1 }
 0x454   : > { %v859_v62 = vpop.f32.mrb[5].mxu1  ;;  %v647_v3 = vadd.f32 %v641_v61, %v598_v2 }
 0x455   : > { %v644_v63 = vpop.f32.mrb[6].mxu1 }
 0x456   : > { %v860_v0 = vpop.f32.mrb[7].mxu1 }
 0x4a1   : > { %v659_v4 = vpop.permute.xlu1 %658 }
 0x4a2   : > { %v661_v5 = vmul.f32 %v659_v4, %v647_v3 }
 0x4a4   : > { %662 = vst [vmem:[%s359_s3] sm:$0xff] %v661_v5 }
 0x4a5   : > { %1102 = shalt.err (!%p1099_p7)
}
 0x4a6   : > { %s1103_s2 = scalar_lea.hbm %s1497_s28, 128  ;;  %s1107_s13 = scalar_lea.hbm %s1552_s6, 256 }
 0x4a7   : > { %p1104_p13 = scmp.ne.s32.totalorder %s1497_s28, %s1103_s2  ;;  %p1108_p2 = scmp.lt.u32.totalorder %s1497_s28, %s1552_s6 }
 0x4a8   : > { %p1109_p12 = scmp.lt.u32.totalorder %s1107_s13, %s1103_s2  ;;  %p1111_p1 = scmp.lt.u32.totalorder %s1103_s2, %s1497_s28 }
 0x4a9   : > { %p1105_p8 = pnand %p1104_p13, %p1579_p6 }
 0x4aa   : > { %p1110_p0 = por %p1109_p12, %p1108_p2 }
 0x4ab   : > { %p1106_p11 = pneg %p1105_p8 }
 0x4ac   : > { %p1112_p10 = por %p1111_p1, %p1110_p0 }
 0x4ae   : > { %p1113_p3 = pnand %p1112_p10, %p1106_p11 }
 0x4b0   : > { %1116 = shalt.err (!%p1113_p3)
}
 0x4b1   : > { %873 = dma.vmem_to_hbm [thread:$0]  (%p1579_p6), %s1499_s18, 128, %s1497_s28, %s664_s11  }
 0x4b2 PF: > { %s690_s29 = sand.u32 1, %s1163_s21   ;;  %p1580_p4 = scmp.ne.s32.totalorder %s1563_s30, 0 }
 0x4b3   : > { %p1581_p9 = scmp.ge.s32.totalorder %s1183_s26, 2  ;;  %s691_s19 = scalar_lea.sflag [#allocation8], %s690_s29 }
 0x4b5   : > { %p890_p5 = pnand %p1581_p9, %p1580_p4 }
 0x4b7   : > { %1158 = dma.done.wait (!%p890_p5), %s691_s19, 128  }
 0x4b8   : > { %1160 = vsyncadd (!%p890_p5), %s691_s19, 4294967168  ;;  %s26_s26 = sadd.s32 1, %s1183_s26   ;;  %s1582_s16 = sld [smem:[#allocation22_spill]] }
 0x4b9   : > { %p23_p7 = scmp.ge.s32.totalorder %s26_s26, 4   ;;  %s1583_s24 = sld [smem:[#allocation20_spill]] }
 0x4ba   : > { %s1584_s25 = sld [smem:[#allocation21_spill]]  ;;  %s1585_s21 = smov %s1167_s22 }
 0x4bb   : > { %s1586_s22 = smov %s1171_s23  ;;  %25 = sbr.rel (!%p23_p7) target bundleno = 12 (0xc), region = 118 }
 0x4be   : > { %s1587_s23 = smov %s1582_s16 }
 0x4c2   :  { %696 = vsyncpa [#allocation7], 1 }
 0x4c3   :  { %698 = vsyncpa [#allocation7 + $0x1], 1 }
 0x4c4   :  { %699 = vsyncpa [#allocation10], 1 }
 0x4c5   :  { %701 = vsyncpa [#allocation10 + $0x1], 1 }
 0x4c6   :  { %702 = vsyncpa [#allocation13], 1 }
 0x4c7   :  { %703 = vsyncpa [#allocation8], 1 }
 0x4c8   :  { %705 = vsyncpa [#allocation8 + $0x1], 1 }

</bundles_post_ra>
